<compile_context>
chip_gen: v6e
topology: v6e:2x2x1
jax: 0.10.0
libtpu: 0.0.40
codegen_flags: <defaults>
</compile_context>

<pallas_src>
import functools

import jax
import jax.numpy as jnp
from jax import lax
from jax.experimental import pallas as pl
from jax.experimental.pallas import tpu as pltpu


# --------------------------------------------------------------------------- #
# Shared in-kernel helpers
# --------------------------------------------------------------------------- #
def _conv3_sigmoid(y, w_ref, channel_axis):
    """3-tap channel conv (zero padded) + sigmoid on the pooled vector.

    y: f32, shape (1, C, 1) if channel_axis == 1 else (1, 1, C).
    z[c] = w0*y[c-1] + w1*y[c] + w2*y[c+1]  (zero padding at both ends).
    O(C): two XLU rolls + edge masks — no banded matrix, no MXU.
    """
    C = y.shape[channel_axis]
    w0 = w_ref[0]
    w1 = w_ref[1]
    w2 = w_ref[2]
    cidx = lax.broadcasted_iota(jnp.int32, y.shape, channel_axis)
    y_prev = jnp.where(cidx == 0, 0.0, pltpu.roll(y, 1, channel_axis))        # y[c-1]
    y_next = jnp.where(cidx == C - 1, 0.0, pltpu.roll(y, C - 1, channel_axis))  # y[c+1]
    z = w1 * y + w0 * y_prev + w2 * y_next
    return jax.nn.sigmoid(z)


# --------------------------------------------------------------------------- #
# Fused single-pass kernel: one (1, C, HW) (or (1, HW, C)) slab per grid step
# --------------------------------------------------------------------------- #
def _eca_fused_kernel(w_ref, x_ref, o_ref, *, channel_axis, spatial_axis):
    x = x_ref[...]                                           # native dtype block
    # Pool with f32 accumulation straight off the native block (no f32 slab temp).
    y = jnp.mean(x, axis=spatial_axis, keepdims=True, dtype=jnp.float32)
    s = _conv3_sigmoid(y, w_ref, channel_axis)               # (1,C,1) / (1,1,C) f32
    # Scale in native dtype (exactly what PyTorch does: everything runs in x.dtype).
    o_ref[...] = (x * s.astype(x.dtype)).astype(o_ref.dtype)


def _eca_fused(x3, w, channel_axis, vmem_limit):
    N, A, B = x3.shape
    spatial_axis = 3 - channel_axis
    kernel = functools.partial(
        _eca_fused_kernel, channel_axis=channel_axis, spatial_axis=spatial_axis)
    return pl.pallas_call(
        kernel,
        out_shape=jax.ShapeDtypeStruct((N, A, B), x3.dtype),
        grid_spec=pltpu.PrefetchScalarGridSpec(
            num_scalar_prefetch=0,
            grid=(N,),
            in_specs=[
                pl.BlockSpec(memory_space=pltpu.MemorySpace.SMEM),   # conv taps (3,)
                pl.BlockSpec((1, A, B), lambda n: (n, 0, 0)),        # x slab
            ],
            out_specs=pl.BlockSpec((1, A, B), lambda n: (n, 0, 0)),
        ),
        compiler_params=pltpu.CompilerParams(
            dimension_semantics=("parallel",),
            vmem_limit_bytes=vmem_limit,
        ),
    )(w, x3)


# --------------------------------------------------------------------------- #
# Reduced-VMEM two-pass path (large slabs, esp. v7x 64 MiB VMEM)
# --------------------------------------------------------------------------- #
def _eca_pool_kernel(w_ref, x_ref, s_ref, *, channel_axis, spatial_axis,
                     hw_total, thw):
    h = pl.program_id(1)

    @pl.when(h == 0)
    def _init():
        s_ref[...] = jnp.zeros_like(s_ref)

    x = x_ref[...]
    if hw_total % thw != 0:
        # Mask the padded tail of the last (partial) spatial tile.
        iota_shape = tuple(x.shape[a] if a == spatial_axis else 1 for a in range(3))
        pos = lax.broadcasted_iota(jnp.int32, iota_shape, spatial_axis) + h * thw
        part = jnp.sum(jnp.where(pos < hw_total, x.astype(jnp.float32), 0.0),
                       axis=spatial_axis, keepdims=True)
    else:
        part = jnp.sum(x, axis=spatial_axis, keepdims=True, dtype=jnp.float32)
    s_ref[...] += part

    @pl.when(h == pl.num_programs(1) - 1)
    def _finalize():
        y = s_ref[...] * (1.0 / float(hw_total))
        s_ref[...] = _conv3_sigmoid(y, w_ref, channel_axis)


def _eca_scale_kernel(s_ref, x_ref, o_ref):
    x = x_ref[...]
    o_ref[...] = (x * s_ref[...].astype(x.dtype)).astype(o_ref.dtype)


def _eca_two_pass(x3, w, channel_axis, thw, vmem_limit):
    N, A, B = x3.shape
    spatial_axis = 3 - channel_axis
    if channel_axis == 1:                       # layout (N, C, HW)
        C, HW = A, B
        x_block = (1, C, thw)
        x_index = lambda n, h: (n, 0, h)
        s_shape, s_block = (N, C, 1), (1, C, 1)
    else:                                       # layout (N, HW, C)
        HW, C = A, B
        x_block = (1, thw, C)
        x_index = lambda n, h: (n, h, 0)
        s_shape, s_block = (N, 1, C), (1, 1, C)
    s_index = lambda n, h: (n, 0, 0)
    n_hw = pl.cdiv(HW, thw)

    pool_kernel = functools.partial(
        _eca_pool_kernel, channel_axis=channel_axis, spatial_axis=spatial_axis,
        hw_total=HW, thw=thw)

    # Pass 1: per-channel mean (accumulated over HW tiles) -> conv -> sigmoid.
    s = pl.pallas_call(
        pool_kernel,
        out_shape=jax.ShapeDtypeStruct(s_shape, jnp.float32),
        grid_spec=pltpu.PrefetchScalarGridSpec(
            num_scalar_prefetch=0,
            grid=(N, n_hw),
            in_specs=[
                pl.BlockSpec(memory_space=pltpu.MemorySpace.SMEM),
                pl.BlockSpec(x_block, x_index),
            ],
            out_specs=pl.BlockSpec(s_block, s_index),
        ),
        compiler_params=pltpu.CompilerParams(
            dimension_semantics=("parallel", "arbitrary"),
            vmem_limit_bytes=vmem_limit,
        ),
    )(w, x3)

    # Pass 2: re-stream x tiles and scale (both grid axes independent).
    out = pl.pallas_call(
        _eca_scale_kernel,
        out_shape=jax.ShapeDtypeStruct((N, A, B), x3.dtype),
        grid_spec=pltpu.PrefetchScalarGridSpec(
            num_scalar_prefetch=0,
            grid=(N, n_hw),
            in_specs=[
                pl.BlockSpec(s_block, s_index),
                pl.BlockSpec(x_block, x_index),
            ],
            out_specs=pl.BlockSpec(x_block, x_index),
        ),
        compiler_params=pltpu.CompilerParams(
            dimension_semantics=("parallel", "parallel"),
            vmem_limit_bytes=vmem_limit,
        ),
    )(s, x3)
    return out


# --------------------------------------------------------------------------- #
# Dispatch / wrapper
# --------------------------------------------------------------------------- #
def _vmem_capacity_bytes():
    try:
        cap = getattr(pltpu.get_tpu_info(), "vmem_capacity_bytes", None)
        if cap:
            return int(cap)
    except Exception:
        pass
    return 64 << 20   # conservative fallback = v7x physical VMEM per TensorCore


def _pick_thw(HW, C, itemsize, budget, channels_last):
    # Scale pass holds double-buffered input + output tiles: 4 * C * thw * itemsize.
    denom = 4 * C * itemsize
    thw = int(min(HW, max(budget // denom, 1)))
    align = 8 if channels_last else 128       # spatial axis = sublane / lane resp.
    if thw >= align:
        thw = (thw // align) * align
    return max(1, thw)


def eca_forward(x, conv_weight, *, vmem_budget_bytes=None):
    """x: (N, C, H, W) NCHW, any float dtype. conv_weight: Conv1d(1,1,3) taps."""
    N, C, H, W = x.shape
    HW = H * W
    w = jnp.asarray(conv_weight).reshape(3).astype(jnp.float32)

    # Layout: keep PyTorch NCHW (channels on sublanes) when HW is lane-friendly;
    # for 7x7 / 14x14 stages (HW % 128 != 0, C % 128 == 0) put channels on the
    # lane axis for unmasked lane-dense stores and no lane padding.
    channels_last = (HW % 128 != 0) and (C % 128 == 0)
    channel_axis = 2 if channels_last else 1
    if channels_last:
        x3 = x.transpose(0, 2, 3, 1).reshape(N, HW, C)
    else:
        x3 = x.reshape(N, C, HW)

    hw_budget = int(0.9 * _vmem_capacity_bytes())
    budget = hw_budget if vmem_budget_bytes is None else min(int(vmem_budget_bytes),
                                                             hw_budget)

    itemsize = x3.dtype.itemsize
    slab = C * HW * itemsize
    # Fused single pass: double-buffered input + output slabs (no resident f32
    # copy of the slab) plus small headroom.
    fused_need = 2 * 2 * slab + (2 << 20)

    if fused_need <= budget:
        vmem_limit = min(max(fused_need, 32 << 20), hw_budget)
        out3 = _eca_fused(x3, w, channel_axis, vmem_limit)
    else:
        # Large-slab fallback (v7x): tile HW, pool then re-stream for the scale.
        # (This path can also be forced for N==1 on v7x to give both TCs work.)
        thw = _pick_thw(HW, C, itemsize, budget, channels_last)
        two_need = 4 * C * thw * itemsize + 8 * C * 4 + (2 << 20)
        vmem_limit = min(max(two_need, 32 << 20), hw_budget)
        out3 = _eca_two_pass(x3, w, channel_axis, thw, vmem_limit)

    if channels_last:
        return out3.reshape(N, H, W, C).transpose(0, 3, 1, 2)
    return out3.reshape(N, C, H, W)


# --------------------------------------------------------------------------- #
# Pure-JAX reference (mirrors the PyTorch forward)
# --------------------------------------------------------------------------- #
def _reference(x, w):
    xf = x.astype(jnp.float32)
    y = jnp.mean(xf, axis=(2, 3))                                    # (N, C)
    yp = jnp.pad(y, ((0, 0), (1, 1)))                                # zero pad
    z = w[0] * yp[:, :-2] + w[1] * yp[:, 1:-1] + w[2] * yp[:, 2:]
    s = jax.nn.sigmoid(z)[:, :, None, None]
    return (xf * s).astype(x.dtype)


if __name__ == "__main__":
    key = jax.random.PRNGKey(0)
    kx1, kx2, kw = jax.random.split(key, 3)

    # Conv1d(1, 1, kernel_size=3, bias=False) weight, PyTorch-style init.
    bound = 1.0 / jnp.sqrt(3.0)
    conv_weight = jax.random.uniform(kw, (3,), minval=-bound, maxval=bound,
                                     dtype=jnp.float32)

    # 1) Fused single-pass path, NCHW layout (HW = 256, multiple of 128).
    x1 = jax.random.normal(kx1, (2, 128, 16, 16), dtype=jnp.float32)
    o1 = jax.block_until_ready(eca_forward(x1, conv_weight))
    r1 = _reference(x1, conv_weight)
    assert o1.shape == x1.shape and o1.dtype == x1.dtype
    assert jnp.allclose(o1, r1, atol=1e-5, rtol=1e-5), float(jnp.max(jnp.abs(o1 - r1)))

    # 2) Lane-dense channels-last path (HW = 7*7 = 49, not a multiple of 128).
    x2 = jax.random.normal(kx2, (2, 128, 7, 7), dtype=jnp.float32)
    o2 = jax.block_until_ready(eca_forward(x2, conv_weight))
    r2 = _reference(x2, conv_weight)
    assert o2.shape == x2.shape and o2.dtype == x2.dtype
    assert jnp.allclose(o2, r2, atol=1e-5, rtol=1e-5), float(jnp.max(jnp.abs(o2 - r2)))

    # 3) Reduced-VMEM two-pass path (forced with a tiny budget) — exercises the
    #    v7x large-slab fallback at small shapes.
    o3 = jax.block_until_ready(eca_forward(x1, conv_weight,
                                           vmem_budget_bytes=256 << 10))
    assert jnp.allclose(o3, r1, atol=1e-5, rtol=1e-5), float(jnp.max(jnp.abs(o3 - r1)))

    print("KERNEL_OK")
</pallas_src>

<mosaic_0001>
module attributes {stable_mosaic.version = 11 : i64} {
  func.func @_eca_fused_kernel(%arg0: i32, %arg1: memref<3xf32, #tpu.memory_space<smem>>, %arg2: memref<1x128x256xf32, #tpu.memory_space<vmem>>, %arg3: memref<1x128x256xf32, #tpu.memory_space<vmem>>) attributes {dimension_semantics = [#tpu.dimension_semantics<parallel>], iteration_bounds = array<i64: 2>, scalar_prefetch = 0 : i64, scratch_operands = 0 : i64, tpu.core_type = #tpu.core_type<tc>, window_params = [{transform_indices = @transform_0, window_bounds = array<i64: 3>}, {transform_indices = @transform_1, window_bounds = array<i64: 1, 128, 256>}, {transform_indices = @transform_2, window_bounds = array<i64: 1, 128, 256>}]} {
    %c0 = arith.constant 0 : index
    %c0_0 = arith.constant 0 : index
    %c0_1 = arith.constant 0 : index
    %0 = vector.load %arg2[%c0, %c0_0, %c0_1] : memref<1x128x256xf32, #tpu.memory_space<vmem>>, vector<1x128x256xf32>
    %cst = arith.constant dense<0.000000e+00> : vector<1x128xf32>
    %1 = vector.multi_reduction <add>, %0, %cst [2] : vector<1x128x256xf32> to vector<1x128xf32>
    %2 = vector.shape_cast %1 : vector<1x128xf32> to vector<1x128x1xf32>
    %cst_2 = arith.constant 2.560000e+02 : f32
    %3 = vector.broadcast %cst_2 : f32 to vector<1x128x1xf32>
    %4 = arith.divf %2, %3 : vector<1x128x1xf32>
    %c0_3 = arith.constant 0 : index
    %5 = memref.load %arg1[%c0_3] : memref<3xf32, #tpu.memory_space<smem>>
    %c1 = arith.constant 1 : index
    %6 = memref.load %arg1[%c1] : memref<3xf32, #tpu.memory_space<smem>>
    %c2 = arith.constant 2 : index
    %7 = memref.load %arg1[%c2] : memref<3xf32, #tpu.memory_space<smem>>
    %8 = tpu.iota {dimensions = array<i32: 1>} : vector<1x128x1xi32>
    %c0_i32 = arith.constant 0 : i32
    %9 = vector.broadcast %c0_i32 : i32 to vector<1x128x1xi32>
    %10 = arith.cmpi eq, %8, %9 : vector<1x128x1xi32>
    %c1_i32 = arith.constant 1 : i32
    %11 = tpu.dynamic_rotate %4 by %c1_i32 dim 1 : vector<1x128x1xf32>, i32 -> vector<1x128x1xf32>
    %cst_4 = arith.constant 0.000000e+00 : f32
    %12 = vector.broadcast %cst_4 : f32 to vector<1x128x1xf32>
    %13 = arith.select %10, %12, %11 : vector<1x128x1xi1>, vector<1x128x1xf32>
    %c127_i32 = arith.constant 127 : i32
    %14 = vector.broadcast %c127_i32 : i32 to vector<1x128x1xi32>
    %15 = arith.cmpi eq, %8, %14 : vector<1x128x1xi32>
    %c127_i32_5 = arith.constant 127 : i32
    %16 = tpu.dynamic_rotate %4 by %c127_i32_5 dim 1 : vector<1x128x1xf32>, i32 -> vector<1x128x1xf32>
    %cst_6 = arith.constant 0.000000e+00 : f32
    %17 = vector.broadcast %cst_6 : f32 to vector<1x128x1xf32>
    %18 = arith.select %15, %17, %16 : vector<1x128x1xi1>, vector<1x128x1xf32>
    %19 = vector.broadcast %6 : f32 to vector<1x128x1xf32>
    %20 = arith.mulf %19, %4 : vector<1x128x1xf32>
    %21 = vector.broadcast %5 : f32 to vector<1x128x1xf32>
    %22 = arith.mulf %21, %13 : vector<1x128x1xf32>
    %23 = arith.addf %20, %22 : vector<1x128x1xf32>
    %24 = vector.broadcast %7 : f32 to vector<1x128x1xf32>
    %25 = arith.mulf %24, %18 : vector<1x128x1xf32>
    %26 = arith.addf %23, %25 : vector<1x128x1xf32>
    %27 = arith.negf %26 : vector<1x128x1xf32>
    %28 = math.exp %27 : vector<1x128x1xf32>
    %cst_7 = arith.constant 1.000000e+00 : f32
    %29 = vector.broadcast %cst_7 : f32 to vector<1x128x1xf32>
    %30 = arith.addf %29, %28 : vector<1x128x1xf32>
    %31 = arith.divf %29, %30 : vector<1x128x1xf32>
    %32 = vector.broadcast %31 : vector<1x128x1xf32> to vector<1x128x256xf32>
    %33 = arith.mulf %0, %32 : vector<1x128x256xf32>
    %c0_8 = arith.constant 0 : index
    %c0_9 = arith.constant 0 : index
    %c0_10 = arith.constant 0 : index
    %34 = vector.load %arg3[%c0_8, %c0_9, %c0_10] : memref<1x128x256xf32, #tpu.memory_space<vmem>>, vector<1x128x256xf32>
    tpu.vector_store %arg3[%c0_8, %c0_9, %c0_10], %33 {strides = array<i32>} : memref<1x128x256xf32, #tpu.memory_space<vmem>>, vector<1x128x256xf32>,
    return
  }
  func.func @transform_0(%arg0: i32) -> i32 {
    %c0_i32 = arith.constant 0 : i32
    %c0_i32_0 = arith.constant 0 : i32
    return %c0_i32 : i32
  }
  func.func @transform_1(%arg0: i32) -> (i32, i32, i32) {
    %c0_i32 = arith.constant 0 : i32
    %c0_i32_0 = arith.constant 0 : i32
    %c0_i32_1 = arith.constant 0 : i32
    return %arg0, %c0_i32, %c0_i32_0 : i32, i32, i32
  }
  func.func @transform_2(%arg0: i32) -> (i32, i32, i32) {
    %c0_i32 = arith.constant 0 : i32
    %c0_i32_0 = arith.constant 0 : i32
    %c0_i32_1 = arith.constant 0 : i32
    return %arg0, %c0_i32, %c0_i32_0 : i32, i32, i32
  }
}

</mosaic_0001>

<bundles_post_ra>
// kernel: tpu_custom_call.1
= control target key start
LH: loop header
LB: loop body
LE: loop exit
PB: predicated region body
PF: predicated region fallthrough
CT: control target
= control target key end

     0   :  { %7 = vsyncpa [#allocation5], 0  ;;  %s1691_s0 = inlined_call_operand.hbm [shape: f32[3], index: 0, kind: input, shape index: {}]   ;;  %s1692_s1 = inlined_call_operand.hbm [shape: f32[2,128,256], index: 1, kind: input, shape index: {}]   ;;  %s1693_s2 = inlined_call_operand.hbm [shape: f32[2,128,256], index: 2, kind: output, shape index: {}]  }
   0x1   :  { %8 = vsyncpa [#allocation3], 0 }
   0x2   :  { %10 = vsyncpa [#allocation3 + $0x1], 0 }
   0x3   :  { %11 = vsyncpa [#allocation4], 0 }
   0x4   :  { %13 = vsyncpa [#allocation4 + $0x1], 0  ;;  %s1139_s9 = smov 0   ;;  %s1141_s10 = smov 0  }
   0x5   :  { %s1143_s11 = smov 0   ;;  %s1145_s12 = smov 0  }
   0x6 LB: > { %s1160_s13 = sadd.s32 4294967295, %s1114_s12   ;;  %s843_s14 = sadd.s32 4294967294, %s1114_s12   ;;  %s1114_s12 = sphi %s1145_s12, %s1743_s12   ;;  %s1110_s11 = sphi %s1143_s11, %s1742_s11   ;;  %s1106_s10 = sphi %s1141_s10, %s1741_s10   ;;  %s1102_s9 = sphi %s1139_s9, %s1740_s9  }
   0x7   : > { %s1164_s15 = sadd.s32 1, %s1114_s12   ;;  %s47_s16 = sadd.s32 1, %s1110_s11 }
   0x8   : > { %s44_s17 = ssub.s32 %s1114_s12, %s1164_s15  ;;  %p54_p0 = scmp.ne.s32.totalorder %s1110_s11, %s1106_s10 }
   0x9   : > { %p45_p1 = scmp.eq.s32.totalorder %s44_s17, 0  ;;  %p55_p2 = scmp.eq.s32.totalorder %s1114_s12, 0 }
   0xa   : > { %p60_p3 = scmp.ne.s32.totalorder %s1106_s10, %s1102_s9  ;;  %p1694_p4 = scmp.eq.s32.totalorder %s1160_s13, 0 }
   0xb   : > { %s1176_s18 = scalar_select %p45_p1, %s1110_s11, %s47_s16  }
   0xc   : > { %p1178_p5 = por %p55_p2, %p54_p0  ;;  %p1184_p6 = por %p1694_p4, %p60_p3 }
   0xd   : > { %p84_p7 = scmp.eq.s32.totalorder %s1160_s13, 1  ;;  %p90_p8 = scmp.eq.s32.totalorder %s843_s14, 1 }
   0xe   : > { %s1709_s20 = scalar_select %p1184_p6, 1, 0 }
   0xf   : > { %p844_p9 = scmp.ge.s32.totalorder %s1114_s12, 1  ;;  %p97_p10 = scmp.lt.s32.totalorder %s1114_s12, 3 }
  0x10   : > { %p1191_p11 = por %p84_p7, %p54_p0  ;;  %p1195_p12 = por %p90_p8, %p60_p3 }
  0x11   : > { %p1199_p13 = pnand %p844_p9, %p97_p10  ;;  %p900_p4 = scmp.lt.s32.totalorder %s1114_s12, 2 }
  0x12   : > { %s1710_s21 = scalar_select %p1191_p11, 1, 0 }
  0x13   : > { %s1711_s22 = scalar_select %p1195_p12, 1, 0 }
  0x14   : > { %s1712_s23 = scalar_select %p1199_p13, 1, 0 }
  0x15   : > { %p887_p2 = pneg %p1199_p13  ;;  %s119_s24 = sand.u32 1, %s1110_s11  }
  0x16   : > { %s877_s25 = sshll.u32 %s1114_s12, 12  ;;  %p1713_p6 = scmp.eq.s32.totalorder %s1160_s13, 0 }
  0x17   : > { %p1213_p7 = pnand %p900_p4, %p1178_p5  ;;  %s847_s27 = sshll.u32 %s119_s24, 8 }
  0x18   : > { %p888_p0 = pnand %p887_p2, %p1713_p6  ;;  %s1116_s28 = smov [#allocation2]  }
  0x19   : > { %s1223_s5 = scalar_lea.hbm %s1692_s1, %s877_s25  ;;  %s123_s6 = scalar_lea.vmem [#allocation6], %s847_s27 }
  0x1a   : > { %890 = dma.hbm_to_smem (!%p888_p0), %s1691_s0, 16, %s1116_s28, [#allocation5]  }
  0x1b   : > { %s130_s7 = sshll.u32 %s123_s6, 4  ;;  %s1227_s8 = scalar_lea.sflag [#allocation3], %s119_s24  ;;  %s1225_s7 = int_to_ptr.vmem [resolvable:$true] %s130_s7 }
  0x1c   : > { %s1018_s14 = scalar_lea.hbm %s1223_s5, 4096  ;;  %p1020_p4 = pneg %p1213_p7 }
  0x1d   : > { %p1019_p3 = scmp.ne.s32.totalorder %s1223_s5, %s1018_s14  ;;  %s1023_s19 = scalar_lea.hbm %s1692_s1, 8192 }
  0x1e   : > { %p1024_p8 = scmp.lt.s32.totalorder %s1223_s5, %s1692_s1  ;;  %p1025_p9 = scmp.lt.s32.totalorder %s1023_s19, %s1018_s14 }
  0x1f   : > { %p1021_p5 = pnand %p1020_p4, %p1019_p3 }
  0x20   : > { %p1026_p10 = por %p1025_p9, %p1024_p8 }
  0x21   : > { %p1022_p6 = pneg %p1021_p5 }
  0x23   : > { %p1027_p2 = pnand %p1026_p10, %p1022_p6 }
  0x25   : > { %1030 = shalt.err (!%p1027_p2)
}
  0x26   : > { %s1031_s24 = scalar_lea.vmem %s1225_s7, 4096  ;;  %s1117_s27 = smov [#allocation6]  }
  0x27   : > { %p1032_p0 = scmp.ne.s32.totalorder %s1225_s7, %s1031_s24  ;;  %s1036_s29 = sshll.u32 %s1117_s27, 4  ;;  %s1037_s29 = int_to_ptr.vmem [resolvable:$false] %s1036_s29 }
  0x28   : > { %s1038_s30 = scalar_lea.vmem %s1037_s29, 8192  ;;  %p1039_p5 = scmp.lt.s32.totalorder %s1225_s7, %s1037_s29 }
  0x29   : > { %p1034_p1 = pnand %p1032_p0, %p1020_p4  ;;  %p1040_p12 = scmp.lt.s32.totalorder %s1038_s30, %s1031_s24 }
  0x2b   : > { %p1035_p3 = pneg %p1034_p1  ;;  %p1041_p11 = por %p1040_p12, %p1039_p5 }
  0x2d   : > { %p1042_p13 = pnand %p1041_p11, %p1035_p3 }
  0x2f   : > { %1045 = shalt.err (!%p1042_p13)
}
  0x30   : > { %s1118_s3 = smov 256   ;;  %s1119_s4 = smov 16  }
  0x31   : > { %894 = dma.hbm_to_vmem [thread:$0]  (!%p1213_p7), %s1223_s5, 4096, %s1225_s7, %s1227_s8, %s1118_s3, %s1118_s3, %s1119_s4  }
  0x32   : > { %p1715_p4 = scmp.ne.s32.totalorder %s1712_s23, 0 }
  0x34   : > { %142 = sbr.rel (%p1715_p4) target bundleno = 444 (0x1bc), region = 28 }
  0x39   : > { %p1716_p1 = scmp.eq.s32.totalorder %s1160_s13, 0 }
  0x3b   : > { %1089 = dma.done.wait (%p1716_p1), [#allocation5], 16   ;;  %p1717_p6 = pmov %p1716_p1 }
  0x3c   : > { %s1255_s6 = sand.u32 1, %s1106_s10   ;;  %p1718_p11 = scmp.ne.s32.totalorder %s1709_s20, 0 }
  0x3d   : > { %1091 = vsyncadd (%p1717_p6), [#allocation5], 4294967280  ;;  %s852_s14 = sshll.u32 %s1255_s6, 8  ;;  %s149_s16 = scalar_lea.sflag [#allocation3], %s1255_s6 }
  0x3e   : > { %s1261_s26 = scalar_lea.vmem [#allocation6], %s852_s14 }
  0x3f   : > { %1093 = dma.done.wait (%p1718_p11), %s149_s16, 4096  }
  0x40   : > { %1095 = vsyncadd (%p1718_p11), %s149_s16, 4294963200 }
  0x41   : > { %157 = sfence }
  0x42   : > { %v1268_v0 = vld [vmem:[%s1261_s26 + $0x10] sm:$0xff]  ;;  %v1271_v1 = vld [vmem:[%s1261_s26 + $0x18] sm:$0xff]  ;;  %v1274_v2 = vld [vmem:[%s1261_s26] sm:$0xff]  ;;  %v1120_v48 = vmov 0   ;;  %v274_v49 = vlaneseq  ;;  %s271_s20 = sld [smem:[#allocation2]]  ;;  %s1577_s7 = scalar_lea.vmem [#allocation7], %s852_s14 }
  0x43   : > { %1719 = vst [vmem:[#allocation11_spill] sm:$0xff] %v1274_v2  ;;  %v209_v3 = vadd.f32 %v1271_v1, %v1268_v0  ;;  %v1279_v4 = vld [vmem:[%s1261_s26 + $0x8] sm:$0xff]  ;;  %v1282_v5 = vld [vmem:[%s1261_s26 + $0x20] sm:$0xff]  ;;  %v1290_v8 = vld [vmem:[%s1261_s26 + $0xf0] sm:$0xff]  ;;  %941 = vset.pattern.permute.xlu1 %v1120_v48  ;;  %942 = vset.pattern.permute.xlu0 %v1120_v48  ;;  %s854_s23 = sld [smem:[#allocation2 + $0x1]]  ;;  %s878_s8 = sshll.u32 %s1160_s13, 12 }
  0x44   : > { %1720 = vst [vmem:[#allocation12_spill] sm:$0xff] %v1279_v4  ;;  %v1285_v6 = vld [vmem:[%s1261_s26 + $0x28] sm:$0xff]  ;;  %v206_v7 = vadd.f32 %v1279_v4, %v1274_v2  ;;  %1721 = vst [vmem:[#allocation13_spill] sm:$0xff] %v1290_v8  ;;  %v1293_v9 = vld [vmem:[%s1261_s26 + $0xf8] sm:$0xff]  ;;  %v1395_v50 = vshrl.u32 %v274_v49, 7  ;;  %s855_s5 = sld [smem:[#allocation2 + $0x2]]  ;;  %s1642_s28 = scalar_lea.hbm %s1693_s2, %s878_s8 }
  0x45   : > { %1722 = vst [vmem:[#allocation14_spill] sm:$0xff] %v1293_v9  ;;  %210 = vadd.xlane.f32.xlu1 %v209_v3  ;;  %v212_v10 = vadd.f32 %v1285_v6, %v1282_v5  ;;  %v251_v11 = vadd.f32 %v1293_v9, %v1290_v8  ;;  %v1300_v12 = vld [vmem:[%s1261_s26 + $0x40] sm:$0xff]  ;;  %v1303_v13 = vld [vmem:[%s1261_s26 + $0x48] sm:$0xff]  ;;  %v1306_v14 = vld [vmem:[%s1261_s26 + $0x30] sm:$0xff]  ;;  %s758_s17 = sshll.u32 %s1577_s7, 4  ;;  %s745_s13 = scalar_lea.sflag [#allocation4], %s1255_s6  ;;  %s1644_s17 = int_to_ptr.vmem [resolvable:$true] %s758_s17 }
  0x46   : > { %207 = vadd.xlane.f32.xlu0 %v206_v7  ;;  %v1309_v15 = vld [vmem:[%s1261_s26 + $0x38] sm:$0xff]  ;;  %v218_v16 = vadd.f32 %v1303_v13, %v1300_v12  ;;  %v1316_v18 = vld [vmem:[%s1261_s26 + $0x60] sm:$0xff]  ;;  %v1319_v19 = vld [vmem:[%s1261_s26 + $0x68] sm:$0xff]  ;;  %vm323_vm0 = vcmp.lt.s32.totalorder %v1395_v50, 1  ;;  %vm388_vm1 = vcmp.lt.s32.totalorder %v1395_v50, 7  ;;  %vm291_vm2 = vcmp.eq.s32.totalorder %v1395_v50, 0 }
  0x47   : > { %v215_v17 = vadd.f32 %v1309_v15, %v1306_v14  ;;  %v1322_v20 = vld [vmem:[%s1261_s26 + $0x50] sm:$0xff]  ;;  %v1325_v21 = vld [vmem:[%s1261_s26 + $0x58] sm:$0xff]  ;;  %v224_v22 = vadd.f32 %v1319_v19, %v1316_v18  ;;  %v1332_v24 = vld [vmem:[%s1261_s26 + $0x80] sm:$0xff]  ;;  %s1046_s24 = scalar_lea.vmem %s1644_s17, 4096  ;;  %p1737_p13 = scmp.ne.s32.totalorder %s1710_s21, 0 }
  0x48   : > { %v221_v23 = vadd.f32 %v1325_v21, %v1322_v20  ;;  %v1335_v25 = vld [vmem:[%s1261_s26 + $0x88] sm:$0xff]  ;;  %v1338_v26 = vld [vmem:[%s1261_s26 + $0x70] sm:$0xff]  ;;  %v1341_v27 = vld [vmem:[%s1261_s26 + $0x78] sm:$0xff]  ;;  %v1400_v56 = vstv %s271_s20  ;;  %p1047_p12 = scmp.ne.s32.totalorder %s1644_s17, %s1046_s24  ;;  %s1121_s27 = smov [#allocation7]  }
  0x49   : > { %213 = vadd.xlane.f32.xlu1 %v212_v10  ;;  %v230_v28 = vadd.f32 %v1335_v25, %v1332_v24  ;;  %v227_v29 = vadd.f32 %v1341_v27, %v1338_v26  ;;  %v1348_v30 = vld [vmem:[%s1261_s26 + $0xa0] sm:$0xff]  ;;  %v1351_v31 = vld [vmem:[%s1261_s26 + $0xa8] sm:$0xff]  ;;  %v1354_v32 = vld [vmem:[%s1261_s26 + $0x90] sm:$0xff]  ;;  %v1403_v59 = vstv %s854_s23  ;;  %s1050_s29 = sshll.u32 %s1121_s27, 4  ;;  %s1051_s29 = int_to_ptr.vmem [resolvable:$false] %s1050_s29 }
  0x4a   : > { %252 = vadd.xlane.f32.xlu0 %v251_v11  ;;  %v1357_v33 = vld [vmem:[%s1261_s26 + $0x98] sm:$0xff]  ;;  %v236_v34 = vadd.f32 %v1351_v31, %v1348_v30  ;;  %v1364_v36 = vld [vmem:[%s1261_s26 + $0xc0] sm:$0xff]  ;;  %v1367_v37 = vld [vmem:[%s1261_s26 + $0xc8] sm:$0xff]  ;;  %p1048_p7 = pnand %p1047_p12, %p1737_p13  ;;  %s1052_s30 = scalar_lea.vmem %s1051_s29, 8192 }
  0x4b   : > { %v233_v35 = vadd.f32 %v1357_v33, %v1354_v32  ;;  %v1370_v38 = vld [vmem:[%s1261_s26 + $0xb0] sm:$0xff]  ;;  %v1373_v39 = vld [vmem:[%s1261_s26 + $0xb8] sm:$0xff]  ;;  %v242_v40 = vadd.f32 %v1367_v37, %v1364_v36  ;;  %v1380_v42 = vld [vmem:[%s1261_s26 + $0xe0] sm:$0xff]  ;;  %p1053_p9 = scmp.lt.s32.totalorder %s1644_s17, %s1051_s29  ;;  %p1054_p10 = scmp.lt.s32.totalorder %s1052_s30, %s1046_s24 }
  0x4c   : > { %v239_v41 = vadd.f32 %v1373_v39, %v1370_v38  ;;  %1723 = vst [vmem:[#allocation15_spill] sm:$0xff] %v1380_v42  ;;  %v1383_v43 = vld [vmem:[%s1261_s26 + $0xe8] sm:$0xff]  ;;  %v1386_v44 = vld [vmem:[%s1261_s26 + $0xd0] sm:$0xff]  ;;  %v1389_v45 = vld [vmem:[%s1261_s26 + $0xd8] sm:$0xff]  ;;  %p1049_p8 = pneg %p1048_p7 }
  0x4d   : > { %219 = vadd.xlane.f32.xlu1 %v218_v16  ;;  %1724 = vst [vmem:[#allocation16_spill] sm:$0xff] %v1383_v43  ;;  %1725 = vst [vmem:[#allocation17_spill] sm:$0xff] %v1386_v44  ;;  %v248_v46 = vadd.f32 %v1383_v43, %v1380_v42  ;;  %v245_v47 = vadd.f32 %v1389_v45, %v1386_v44  ;;  %p1055_p2 = por %p1054_p10, %p1053_p9 }
  0x4e   : > { %216 = vadd.xlane.f32.xlu0 %v215_v17  ;;  %1726 = vst [vmem:[#allocation18_spill] sm:$0xff] %v1389_v45 }
  0x4f   : > { %p1056_p0 = pnand %p1055_p2, %p1049_p8 }
  0x51   : > { %225 = vadd.xlane.f32.xlu1 %v224_v22 }
  0x52   : > { %222 = vadd.xlane.f32.xlu0 %v221_v23 }
  0x55   : > { %231 = vadd.xlane.f32.xlu1 %v230_v28  ;;  %v1414_v28 = vstv %s855_s5 }
  0x56   : > { %228 = vadd.xlane.f32.xlu0 %v227_v29 }
  0x59   : > { %237 = vadd.xlane.f32.xlu1 %v236_v34 }
  0x5a   : > { %234 = vadd.xlane.f32.xlu0 %v233_v35 }
  0x5d   : > { %243 = vadd.xlane.f32.xlu1 %v242_v40 }
  0x5e   : > { %240 = vadd.xlane.f32.xlu0 %v239_v41 }
  0x61   : > { %249 = vadd.xlane.f32.xlu1 %v248_v46 }
  0x62   : > { %246 = vadd.xlane.f32.xlu0 %v245_v47 }
  0xce   : > { %v211_v51 = vpop.xlane.xlu1 %210 }
  0xcf   : > { %v256_v52 = vmul.f32 0.00390625, %v211_v51  ;;  %v208_v53 = vpop.xlane.xlu0 %207 }
  0xd0   : > { %v1397_v54 = vmul.f32 0.00390625, %v208_v53  ;;  %v1433_v53 = vadd.s32 120, %v1395_v50 }
  0xd1   : > { %v308_v55 = vrot.slane %v256_v52, 7  ;;  %v373_v62 = vrot.slane %v256_v52, 1  ;;  %v423_v17 = vmul.f32 %v1403_v59, %v256_v52 }
  0xd2   : > { %v307_v57 = vrot.slane %v1397_v54, 7  ;;  %v214_v58 = vpop.xlane.xlu1 %213  ;;  %v1699_v7 = vrot.slane %v1397_v54, 1  ;;  %vm371_vm3 = vcmp.eq.s32.totalorder %v1433_v53, 127 }
  0xd3   : > { %v257_v60 = vmul.f32 0.00390625, %v214_v58  ;;  %v253_v61 = vpop.xlane.xlu0 %252 }
  0xd4   : > { %v338_v63 = vsel %vm323_vm0, %v307_v57, %v308_v55  ;;  %v1407_v3 = vmul.f32 0.00390625, %v253_v61  ;;  %v403_v47 = vsel %vm388_vm1, %v1699_v7, %v373_v62 }
  0xd5   : > { %v440_v10 = vmul.f32 %v1400_v56, %v338_v63  ;;  %v309_v11 = vrot.slane %v257_v60, 7  ;;  %v374_v16 = vrot.slane %v257_v60, 1  ;;  %v424_v51 = vmul.f32 %v1403_v59, %v257_v60 }
  0xd6   : > { %v1698_v22 = vrot.slane %v1407_v3, 7  ;;  %v220_v23 = vpop.xlane.xlu1 %219 }
  0xd7   : > { %v337_v29 = vsel %vm323_vm0, %v308_v55, %v309_v11  ;;  %v402_v34 = vsel %vm388_vm1, %v373_v62, %v374_v16  ;;  %v259_v35 = vmul.f32 0.00390625, %v220_v23  ;;  %v217_v40 = vpop.xlane.xlu0 %216  ;;  %v456_v41 = vadd.f32 %v440_v10, %v423_v17 }
  0xd8   : > { %v473_v46 = vmul.f32 %v1414_v28, %v402_v34  ;;  %v441_v48 = vmul.f32 %v1400_v56, %v337_v29  ;;  %v339_v49 = vsel %vm323_vm0, %v1698_v22, %v307_v57  ;;  %v258_v63 = vmul.f32 0.00390625, %v217_v40 }
  0xd9   : > { %v311_v58 = vrot.slane %v259_v35, 7  ;;  %v376_v61 = vrot.slane %v259_v35, 1  ;;  %v1439_v17 = vmul.f32 %v1403_v59, %v1397_v54  ;;  %v1442_v23 = vmul.f32 %v1414_v28, %v403_v47 }
  0xda   : > { %v489_v52 = vadd.f32 %v473_v46, %v456_v41  ;;  %v226_v55 = vpop.xlane.xlu1 %225  ;;  %v1444_v60 = vsel %vm291_vm2, 0.0, %v339_v49  ;;  %v457_v29 = vadd.f32 %v441_v48, %v424_v51  ;;  %v310_v34 = vrot.slane %v258_v63, 7 }
  0xdb   : > { %v1435_v62 = vmul.f32 0.00390625, %v226_v55  ;;  %v223_v10 = vpop.xlane.xlu0 %222  ;;  %v375_v41 = vrot.slane %v258_v63, 1  ;;  %v426_v40 = vmul.f32 %v1403_v59, %v259_v35  ;;  %v425_v51 = vmul.f32 %v1403_v59, %v258_v63 }
  0xdc   : > { %v857_v57 = vmul.f32 -1.442695, %v489_v52  ;;  %v260_v46 = vmul.f32 0.00390625, %v223_v10  ;;  %v335_v7 = vsel %vm323_vm0, %v310_v34, %v311_v58  ;;  %v336_v47 = vsel %vm323_vm0, %v309_v11, %v310_v34 }
  0xdd   : > { %v313_v55 = vrot.slane %v1435_v62, 7  ;;  %v378_v22 = vrot.slane %v1435_v62, 1  ;;  %v400_v49 = vsel %vm388_vm1, %v375_v41, %v376_v61  ;;  %v401_v48 = vsel %vm388_vm1, %v374_v16, %v375_v41 }
  0xde   : > { %943 = vpow2.f32 %v857_v57  ;;  %v442_v35 = vmul.f32 %v1400_v56, %v336_v47  ;;  %v443_v52 = vmul.f32 %v1400_v56, %v335_v7  ;;  %v474_v10 = vmul.f32 %v1414_v28, %v401_v48  ;;  %v232_v57 = vpop.xlane.xlu1 %231 }
  0xdf   : > { %v229_v9 = vpop.xlane.xlu0 %228  ;;  %v475_v8 = vmul.f32 %v1414_v28, %v400_v49  ;;  %v428_v11 = vmul.f32 %v1403_v59, %v1435_v62  ;;  %v312_v34 = vrot.slane %v260_v46, 7  ;;  %v377_v4 = vrot.slane %v260_v46, 1 }
  0xe0   : > { %v458_v2 = vadd.f32 %v442_v35, %v425_v51  ;;  %v459_v43 = vadd.f32 %v443_v52, %v426_v40  ;;  %v490_v16 = vadd.f32 %v474_v10, %v457_v29  ;;  %v427_v63 = vmul.f32 %v1403_v59, %v260_v46 }
  0xe1   : > { %v333_v41 = vsel %vm323_vm0, %v312_v34, %v313_v55  ;;  %v334_v7 = vsel %vm323_vm0, %v311_v58, %v312_v34  ;;  %v398_v47 = vsel %vm388_vm1, %v377_v4, %v378_v22  ;;  %v399_v49 = vsel %vm388_vm1, %v376_v61, %v377_v4 }
  0xe2   : > { %v491_v62 = vadd.f32 %v475_v8, %v458_v2  ;;  %v858_v48 = vmul.f32 -1.442695, %v490_v16  ;;  %v444_v51 = vmul.f32 %v1400_v56, %v334_v7  ;;  %v445_v29 = vmul.f32 %v1400_v56, %v333_v41  ;;  %v238_v42 = vpop.xlane.xlu1 %237 }
  0xe3   : > { %v476_v46 = vmul.f32 %v1414_v28, %v399_v49  ;;  %v477_v40 = vmul.f32 %v1414_v28, %v398_v47  ;;  %v263_v35 = vmul.f32 0.00390625, %v232_v57  ;;  %v262_v52 = vmul.f32 0.00390625, %v229_v9  ;;  %v235_v45 = vpop.xlane.xlu0 %234 }
  0xe4   : > { %945 = vpow2.f32 %v858_v48  ;;  %v859_v58 = vmul.f32 -1.442695, %v491_v62  ;;  %v460_v10 = vadd.f32 %v444_v51, %v427_v63  ;;  %v461_v34 = vadd.f32 %v445_v29, %v428_v11 }
  0xe5   : > { %v492_v44 = vadd.f32 %v476_v46, %v459_v43  ;;  %v315_v4 = vrot.slane %v263_v35, 7  ;;  %v380_v2 = vrot.slane %v263_v35, 1  ;;  %v430_v8 = vmul.f32 %v1403_v59, %v263_v35 }
  0xe6   : > { %947 = vpow2.f32 %v859_v58  ;;  %v493_v61 = vadd.f32 %v477_v40, %v460_v10  ;;  %v314_v16 = vrot.slane %v262_v52, 7  ;;  %v379_v41 = vrot.slane %v262_v52, 1  ;;  %v244_v46 = vpop.xlane.xlu1 %243 }
  0xe7   : > { %v860_v7 = vmul.f32 -1.442695, %v492_v44  ;;  %v429_v47 = vmul.f32 %v1403_v59, %v262_v52  ;;  %v1479_v57 = vmul.f32 0.00390625, %v238_v42  ;;  %v264_v9 = vmul.f32 0.00390625, %v235_v45 }
  0xe8   : > { %v861_v49 = vmul.f32 -1.442695, %v493_v61  ;;  %v331_v11 = vsel %vm323_vm0, %v314_v16, %v315_v4  ;;  %v332_v43 = vsel %vm323_vm0, %v313_v55, %v314_v16  ;;  %v396_v63 = vsel %vm388_vm1, %v379_v41, %v380_v2 }
  0xe9   : > { %949 = vpow2.f32 %v860_v7  ;;  %v397_v44 = vsel %vm388_vm1, %v378_v22, %v379_v41  ;;  %v446_v48 = vmul.f32 %v1400_v56, %v332_v43  ;;  %v447_v42 = vmul.f32 %v1400_v56, %v331_v11 }
  0xea   : > { %951 = vpow2.f32 %v861_v49  ;;  %v478_v51 = vmul.f32 %v1414_v28, %v397_v44  ;;  %v479_v29 = vmul.f32 %v1414_v28, %v396_v63  ;;  %v387_v55 = vrot.slane %v1407_v3, 1  ;;  %v241_v49 = vpop.xlane.xlu0 %240 }
  0xeb   : > { %v944_v62 = vpop.eup %943  ;;  %v462_v40 = vadd.f32 %v446_v48, %v429_v47  ;;  %v317_v35 = vrot.slane %v1479_v57, 7  ;;  %v382_v52 = vrot.slane %v1479_v57, 1  ;;  %v439_v22 = vmul.f32 %v1400_v56, %v1444_v60 }
  0xec   : > { %v553_v45 = vadd.f32 1.0, %v944_v62  ;;  %v494_v58 = vadd.f32 %v478_v51, %v461_v34  ;;  %v316_v10 = vrot.slane %v264_v9, 7  ;;  %v463_v61 = vadd.f32 %v447_v42, %v430_v8  ;;  %v250_v42 = vpop.xlane.xlu1 %249 }
  0xed   : > { %v495_v16 = vadd.f32 %v479_v29, %v462_v40  ;;  %v381_v41 = vrot.slane %v264_v9, 1  ;;  %v431_v7 = vmul.f32 %v1403_v59, %v264_v9  ;;  %v1503_v63 = vmul.f32 0.00390625, %v244_v46 }
  0xee   : > { %953 = vrcp.f32 %v553_v45  ;;  %v862_v11 = vmul.f32 -1.442695, %v494_v58  ;;  %v329_v47 = vsel %vm323_vm0, %v316_v10, %v317_v35  ;;  %v330_v43 = vsel %vm323_vm0, %v315_v4, %v316_v10 }
  0xef   : > { %v863_v62 = vmul.f32 -1.442695, %v495_v16  ;;  %v394_v60 = vsel %vm388_vm1, %v381_v41, %v382_v52  ;;  %v395_v34 = vsel %vm388_vm1, %v380_v2, %v381_v41  ;;  %v448_v8 = vmul.f32 %v1400_v56, %v330_v43  ;;  %v247_v43 = vpop.xlane.xlu0 %246 }
  0xf0   : > { %v432_v9 = vmul.f32 %v1403_v59, %v1479_v57  ;;  %v449_v44 = vmul.f32 %v1400_v56, %v329_v47  ;;  %v480_v48 = vmul.f32 %v1414_v28, %v395_v34  ;;  %v481_v4 = vmul.f32 %v1414_v28, %v394_v60 }
  0xf1   : > { %v946_v45 = vpop.eup %945  ;;  %v1517_v51 = vmul.f32 %v1403_v59, %v1407_v3  ;;  %v455_v29 = vadd.f32 %v439_v22, %v1439_v17  ;;  %955 = vpow2.f32 %v862_v11  ;;  %v464_v2 = vadd.f32 %v448_v8, %v431_v7 }
  0xf2   : > { %v554_v46 = vadd.f32 1.0, %v946_v45  ;;  %v496_v40 = vadd.f32 %v480_v48, %v463_v61  ;;  %v319_v57 = vrot.slane %v1503_v63, 7  ;;  %v384_v58 = vrot.slane %v1503_v63, 1 }
  0xf3   : > { %v948_v10 = vpop.eup %947  ;;  %957 = vpow2.f32 %v863_v62  ;;  %v497_v16 = vadd.f32 %v481_v4, %v464_v2  ;;  %v266_v41 = vmul.f32 0.00390625, %v241_v49  ;;  %v269_v47 = vmul.f32 0.00390625, %v250_v42 }
  0xf4   : > { %v555_v60 = vadd.f32 1.0, %v948_v10  ;;  %959 = vrcp.f32 %v554_v46  ;;  %v465_v34 = vadd.f32 %v449_v44, %v432_v9  ;;  %v864_v17 = vmul.f32 -1.442695, %v496_v40 }
  0xf5   : > { %v865_v22 = vmul.f32 -1.442695, %v497_v16  ;;  %v434_v61 = vmul.f32 %v1403_v59, %v1503_v63  ;;  %v318_v7 = vrot.slane %v266_v41, 7  ;;  %v383_v11 = vrot.slane %v266_v41, 1 }
  0xf6   : > { %v950_v8 = vpop.eup %949  ;;  %961 = vrcp.f32 %v555_v60  ;;  %v433_v62 = vmul.f32 %v1403_v59, %v266_v41  ;;  %v321_v48 = vrot.slane %v269_v47, 7  ;;  %v268_v49 = vmul.f32 0.00390625, %v247_v43 }
  0xf7   : > { %v952_v4 = vpop.eup %951  ;;  %v556_v42 = vadd.f32 1.0, %v950_v8  ;;  %963 = vpow2.f32 %v864_v17  ;;  %v327_v45 = vsel %vm323_vm0, %v318_v7, %v319_v57  ;;  %v328_v9 = vsel %vm323_vm0, %v317_v35, %v318_v7 }
  0xf8   : > { %v557_v44 = vadd.f32 1.0, %v952_v4  ;;  %965 = vpow2.f32 %v865_v22  ;;  %v392_v63 = vsel %vm388_vm1, %v383_v11, %v384_v58  ;;  %v393_v2 = vsel %vm388_vm1, %v382_v52, %v383_v11 }
  0xf9   : > { %v1727_v40 = vrot.slane %v1397_v54, 1  ;;  %v450_v16 = vmul.f32 %v1400_v56, %v328_v9  ;;  %v451_v35 = vmul.f32 %v1400_v56, %v327_v45  ;;  %v482_v41 = vmul.f32 %v1414_v28, %v393_v2 }
  0xfa   : > { %v488_v43 = vadd.f32 %v1442_v23, %v455_v29  ;;  %v483_v60 = vmul.f32 %v1414_v28, %v392_v63  ;;  %v1728_v52 = vrot.slane %v1407_v3, 7  ;;  %v386_v17 = vrot.slane %v269_v47, 1 }
  0xfb   : > { %v954_v46 = vpop.eup %953  ;;  %v404_v10 = vsel %vm388_vm1, %v387_v55, %v1727_v40  ;;  %967 = vrcp.f32 %v556_v42  ;;  %v466_v22 = vadd.f32 %v450_v16, %v433_v62  ;;  %v498_v7 = vadd.f32 %v482_v41, %v465_v34 }
  0xfc   : > { %v324_v54 = vsel %vm323_vm0, %v321_v48, %v1728_v52  ;;  %607 = vperm.xlu1 %941, %v954_v46   ;;  %v436_v11 = vmul.f32 %v1403_v59, %v269_v47  ;;  %969 = vrcp.f32 %v557_v44  ;;  %v467_v8 = vadd.f32 %v451_v35, %v434_v61 }
  0xfd   : > { %v320_v4 = vrot.slane %v268_v49, 7  ;;  %v385_v45 = vrot.slane %v268_v49, 1  ;;  %v499_v9 = vadd.f32 %v483_v60, %v466_v22  ;;  %v866_v23 = vmul.f32 -1.442695, %v498_v7 }
  0xfe   : > { %v454_v29 = vmul.f32 %v1400_v56, %v324_v54  ;;  %v435_v63 = vmul.f32 %v1403_v59, %v268_v49  ;;  %v956_v2 = vpop.eup %955  ;;  %v420_v61 = vsel %vm371_vm3, 0.0, %v404_v10  ;;  %v389_v59 = vsel %vm388_vm1, %v386_v17, %v387_v55 }
  0xff   : > { %v325_v40 = vsel %vm323_vm0, %v320_v4, %v321_v48  ;;  %v326_v62 = vsel %vm323_vm0, %v319_v57, %v320_v4  ;;  %v390_v47 = vsel %vm388_vm1, %v385_v45, %v386_v17  ;;  %v391_v34 = vsel %vm388_vm1, %v384_v58, %v385_v45 }
 0x100   : > { %971 = vpow2.f32 %v866_v23  ;;  %v867_v42 = vmul.f32 -1.442695, %v499_v9  ;;  %v958_v48 = vpop.eup %957  ;;  %v558_v49 = vadd.f32 1.0, %v956_v2  ;;  %v452_v57 = vmul.f32 %v1400_v56, %v326_v62 }
 0x101   : > { %v453_v44 = vmul.f32 %v1400_v56, %v325_v40  ;;  %v484_v46 = vmul.f32 %v1414_v28, %v391_v34  ;;  %v960_v16 = vpop.eup %959  ;;  %v856_v58 = vmul.f32 -1.442695, %v488_v43  ;;  %v470_v53 = vadd.f32 %v454_v29, %v1517_v51 }
 0x102   : > { %v485_v10 = vmul.f32 %v1414_v28, %v390_v47  ;;  %v486_v35 = vmul.f32 %v1414_v28, %v389_v59  ;;  %v468_v3 = vadd.f32 %v452_v57, %v435_v63  ;;  %612 = vperm.xlu1 %941, %v960_v16   ;;  %v487_v60 = vmul.f32 %v1414_v28, %v420_v61 }
 0x103   : > { %v469_v41 = vadd.f32 %v453_v44, %v436_v11  ;;  %v500_v50 = vadd.f32 %v484_v46, %v467_v8  ;;  %v962_v55 = vpop.eup %961  ;;  %v559_v52 = vadd.f32 1.0, %v958_v48  ;;  %973 = vpow2.f32 %v867_v42 }
 0x104   : > { %v964_v56 = vpop.eup %963  ;;  %975 = vrcp.f32 %v558_v49  ;;  %v501_v54 = vadd.f32 %v485_v10, %v468_v3  ;;  %v503_v51 = vadd.f32 %v487_v60, %v470_v53 }
 0x105   : > { %v502_v17 = vadd.f32 %v486_v35, %v469_v41  ;;  %v868_v43 = vmul.f32 -1.442695, %v500_v50  ;;  %v966_v22 = vpop.eup %965  ;;  %977 = vpow2.f32 %v856_v58  ;;  %v560_v8 = vadd.f32 1.0, %v964_v56 }
 0x106   : > { %v561_v7 = vadd.f32 1.0, %v966_v22  ;;  %v869_v4 = vmul.f32 -1.442695, %v501_v54  ;;  %617 = vperm.xlu1 %941, %v962_v55   ;;  %v871_v9 = vmul.f32 -1.442695, %v503_v51 }
 0x107   : > { %979 = vpow2.f32 %v868_v43  ;;  %v870_v45 = vmul.f32 -1.442695, %v502_v17 }
 0x108   : > { %981 = vrcp.f32 %v559_v52  ;;  %v968_v11 = vpop.eup %967 }
 0x109   : > { %983 = vrcp.f32 %v561_v7  ;;  %v970_v28 = vpop.eup %969 }
 0x10a   : > { %985 = vpow2.f32 %v869_v4  ;;  %622 = vperm.xlu1 %941, %v968_v11  }
 0x10b   : > { %987 = vpow2.f32 %v870_v45 }
 0x10c   : > { %989 = vrcp.f32 %v560_v8 }
 0x10d   : > { %v972_v23 = vpop.eup %971  ;;  %991 = vpow2.f32 %v871_v9 }
 0x10e   : > { %v562_v29 = vadd.f32 1.0, %v972_v23  ;;  %627 = vperm.xlu1 %941, %v970_v28  }
 0x110   : > { %v974_v63 = vpop.eup %973  ;;  %993 = vrcp.f32 %v562_v29 }
 0x111   : > { %v976_v2 = vpop.eup %975  ;;  %v563_v40 = vadd.f32 1.0, %v974_v63  ;;  %v1729_v63 = vld [vmem:[#allocation17_spill] sm:$0xff] }
 0x112   : > { %v978_v62 = vpop.eup %977  ;;  %632 = vperm.xlu1 %941, %v976_v2   ;;  %v1730_v2 = vld [vmem:[#allocation18_spill] sm:$0xff] }
 0x113   : > { %995 = vrcp.f32 %v563_v40  ;;  %v552_v46 = vadd.f32 1.0, %v978_v62  ;;  %v1731_v62 = vld [vmem:[#allocation15_spill] sm:$0xff] }
 0x114   : > { %v980_v47 = vpop.eup %979 }
 0x115   : > { %v982_v34 = vpop.eup %981  ;;  %v564_v61 = vadd.f32 1.0, %v980_v47 }
 0x116   : > { %v984_v42 = vpop.eup %983  ;;  %637 = vperm.xlu1 %941, %v982_v34   ;;  %v1732_v34 = vld [vmem:[#allocation16_spill] sm:$0xff] }
 0x117   : > { %v986_v59 = vpop.eup %985  ;;  %997 = vrcp.f32 %v564_v61  ;;  %647 = vperm.xlu0 %942, %v984_v42  }
 0x118   : > { %v988_v48 = vpop.eup %987  ;;  %v565_v49 = vadd.f32 1.0, %v986_v59  ;;  %v1734_v59 = vld [vmem:[#allocation12_spill] sm:$0xff] }
 0x119   : > { %v566_v57 = vadd.f32 1.0, %v988_v48  ;;  %v990_v44 = vpop.eup %989 }
 0x11a   : > { %999 = vrcp.f32 %v565_v49  ;;  %v992_v16 = vpop.eup %991  ;;  %642 = vperm.xlu1 %941, %v990_v44  }
 0x11b   : > { %1001 = vrcp.f32 %v566_v57  ;;  %v567_v53 = vadd.f32 1.0, %v992_v16  ;;  %v1735_v57 = vld [vmem:[#allocation13_spill] sm:$0xff] }
 0x11c   : > { %1003 = vrcp.f32 %v552_v46  ;;  %v1736_v46 = vld [vmem:[#allocation14_spill] sm:$0xff] }
 0x11d   : > { %v994_v58 = vpop.eup %993  ;;  %1005 = vrcp.f32 %v567_v53 }
 0x11e   : > { %652 = vperm.xlu1 %941, %v994_v58  }
 0x120   : > { %v996_v10 = vpop.eup %995 }
 0x121   : > { %657 = vperm.xlu0 %942, %v996_v10  }
 0x124   : > { %v998_v35 = vpop.eup %997 }
 0x125   : > { %662 = vperm.xlu1 %941, %v998_v35  }
 0x127   : > { %v1000_v3 = vpop.eup %999 }
 0x128   : > { %v1002_v41 = vpop.eup %1001  ;;  %667 = vperm.xlu0 %942, %v1000_v3  }
 0x129   : > { %672 = vperm.xlu1 %941, %v1002_v41   ;;  %v1004_v50 = vpop.eup %1003 }
 0x12a   : > { %v1006_v55 = vpop.eup %1005 }
 0x12c   : > { %602 = vperm.xlu0 %942, %v1004_v50  }
 0x130   : > { %677 = vperm.xlu0 %942, %v1006_v55  }
 0x177   : > { %v608_v60 = vpop.permute.xlu1 %607 }
 0x178   : > { %v682_v52 = vmul.f32 %v608_v60, %v1268_v0  ;;  %v683_v56 = vmul.f32 %v608_v60, %v1271_v1 }
 0x17a   : > { %714 = vst [vmem:[%s1577_s7 + $0x10] sm:$0xff] %v682_v52  ;;  %715 = vst [vmem:[%s1577_s7 + $0x18] sm:$0xff] %v683_v56 }
 0x17d   : > { %v613_v54 = vpop.permute.xlu1 %612 }
 0x17e   : > { %v684_v17 = vmul.f32 %v613_v54, %v1282_v5  ;;  %v685_v0 = vmul.f32 %v613_v54, %v1285_v6 }
 0x180   : > { %716 = vst [vmem:[%s1577_s7 + $0x20] sm:$0xff] %v684_v17  ;;  %717 = vst [vmem:[%s1577_s7 + $0x28] sm:$0xff] %v685_v0 }
 0x181   : > { %v618_v1 = vpop.permute.xlu1 %617 }
 0x182   : > { %v686_v43 = vmul.f32 %v618_v1, %v1306_v14  ;;  %v687_v22 = vmul.f32 %v618_v1, %v1309_v15 }
 0x184   : > { %718 = vst [vmem:[%s1577_s7 + $0x30] sm:$0xff] %v686_v43  ;;  %719 = vst [vmem:[%s1577_s7 + $0x38] sm:$0xff] %v687_v22 }
 0x185   : > { %v623_v51 = vpop.permute.xlu1 %622 }
 0x186   : > { %v688_v7 = vmul.f32 %v623_v51, %v1300_v12  ;;  %v689_v5 = vmul.f32 %v623_v51, %v1303_v13 }
 0x188   : > { %720 = vst [vmem:[%s1577_s7 + $0x40] sm:$0xff] %v688_v7  ;;  %721 = vst [vmem:[%s1577_s7 + $0x48] sm:$0xff] %v689_v5 }
 0x189   : > { %v628_v6 = vpop.permute.xlu1 %627 }
 0x18a   : > { %v690_v4 = vmul.f32 %v628_v6, %v1322_v20  ;;  %v691_v14 = vmul.f32 %v628_v6, %v1325_v21 }
 0x18c   : > { %722 = vst [vmem:[%s1577_s7 + $0x50] sm:$0xff] %v690_v4  ;;  %723 = vst [vmem:[%s1577_s7 + $0x58] sm:$0xff] %v691_v14 }
 0x18d   : > { %v633_v15 = vpop.permute.xlu1 %632 }
 0x18e   : > { %v692_v45 = vmul.f32 %v633_v15, %v1316_v18  ;;  %v693_v12 = vmul.f32 %v633_v15, %v1319_v19 }
 0x190   : > { %724 = vst [vmem:[%s1577_s7 + $0x60] sm:$0xff] %v692_v45  ;;  %725 = vst [vmem:[%s1577_s7 + $0x68] sm:$0xff] %v693_v12 }
 0x191   : > { %v638_v11 = vpop.permute.xlu1 %637 }
 0x192   : > { %v648_v13 = vpop.permute.xlu0 %647  ;;  %v694_v21 = vmul.f32 %v638_v11, %v1338_v26  ;;  %v695_v28 = vmul.f32 %v638_v11, %v1341_v27 }
 0x193   : > { %v698_v20 = vmul.f32 %v648_v13, %v1354_v32  ;;  %v699_v8 = vmul.f32 %v648_v13, %v1357_v33 }
 0x194   : > { %726 = vst [vmem:[%s1577_s7 + $0x70] sm:$0xff] %v694_v21  ;;  %727 = vst [vmem:[%s1577_s7 + $0x78] sm:$0xff] %v695_v28 }
 0x195   : > { %730 = vst [vmem:[%s1577_s7 + $0x90] sm:$0xff] %v698_v20  ;;  %731 = vst [vmem:[%s1577_s7 + $0x98] sm:$0xff] %v699_v8  ;;  %v643_v18 = vpop.permute.xlu1 %642 }
 0x196   : > { %v696_v19 = vmul.f32 %v643_v18, %v1332_v24  ;;  %v697_v9 = vmul.f32 %v643_v18, %v1335_v25 }
 0x198   : > { %728 = vst [vmem:[%s1577_s7 + $0x80] sm:$0xff] %v696_v19  ;;  %729 = vst [vmem:[%s1577_s7 + $0x88] sm:$0xff] %v697_v9 }
 0x199   : > { %v653_v32 = vpop.permute.xlu1 %652 }
 0x19a   : > { %v700_v26 = vmul.f32 %v653_v32, %v1348_v30  ;;  %v701_v27 = vmul.f32 %v653_v32, %v1351_v31 }
 0x19c   : > { %v658_v33 = vpop.permute.xlu0 %657  ;;  %732 = vst [vmem:[%s1577_s7 + $0xa0] sm:$0xff] %v700_v26  ;;  %733 = vst [vmem:[%s1577_s7 + $0xa8] sm:$0xff] %v701_v27 }
 0x19d   : > { %v702_v23 = vmul.f32 %v658_v33, %v1370_v38  ;;  %v703_v24 = vmul.f32 %v658_v33, %v1373_v39 }
 0x19f   : > { %734 = vst [vmem:[%s1577_s7 + $0xb0] sm:$0xff] %v702_v23  ;;  %735 = vst [vmem:[%s1577_s7 + $0xb8] sm:$0xff] %v703_v24 }
 0x1a0   : > { %v663_v25 = vpop.permute.xlu1 %662 }
 0x1a1   : > { %v704_v29 = vmul.f32 %v663_v25, %v1364_v36  ;;  %v705_v30 = vmul.f32 %v663_v25, %v1367_v37  ;;  %v1733_v37 = vld [vmem:[#allocation11_spill] sm:$0xff] }
 0x1a3   : > { %v668_v31 = vpop.permute.xlu0 %667  ;;  %736 = vst [vmem:[%s1577_s7 + $0xc0] sm:$0xff] %v704_v29  ;;  %737 = vst [vmem:[%s1577_s7 + $0xc8] sm:$0xff] %v705_v30 }
 0x1a4   : > { %v706_v38 = vmul.f32 %v668_v31, %v1729_v63  ;;  %v707_v39 = vmul.f32 %v668_v31, %v1730_v2  ;;  %v673_v40 = vpop.permute.xlu1 %672 }
 0x1a5   : > { %v708_v47 = vmul.f32 %v673_v40, %v1731_v62  ;;  %v709_v61 = vmul.f32 %v673_v40, %v1732_v34 }
 0x1a6   : > { %738 = vst [vmem:[%s1577_s7 + $0xd0] sm:$0xff] %v706_v38  ;;  %739 = vst [vmem:[%s1577_s7 + $0xd8] sm:$0xff] %v707_v39 }
 0x1a7   : > { %v603_v36 = vpop.permute.xlu0 %602  ;;  %740 = vst [vmem:[%s1577_s7 + $0xe0] sm:$0xff] %v708_v47  ;;  %741 = vst [vmem:[%s1577_s7 + $0xe8] sm:$0xff] %v709_v61 }
 0x1a8   : > { %v680_v42 = vmul.f32 %v603_v36, %v1733_v37  ;;  %v681_v48 = vmul.f32 %v603_v36, %v1734_v59 }
 0x1aa   : > { %712 = vst [vmem:[%s1577_s7] sm:$0xff] %v680_v42  ;;  %713 = vst [vmem:[%s1577_s7 + $0x8] sm:$0xff] %v681_v48 }
 0x1ab   : > { %v678_v49 = vpop.permute.xlu0 %677 }
 0x1ac   : > { %v710_v44 = vmul.f32 %v678_v49, %v1735_v57  ;;  %v711_v16 = vmul.f32 %v678_v49, %v1736_v46 }
 0x1ae   : > { %742 = vst [vmem:[%s1577_s7 + $0xf0] sm:$0xff] %v710_v44  ;;  %743 = vst [vmem:[%s1577_s7 + $0xf8] sm:$0xff] %v711_v16 }
 0x1af   : > { %1059 = shalt.err (!%p1056_p0)
}
 0x1b0   : > { %s1060_s3 = scalar_lea.hbm %s1642_s28, 4096  ;;  %s1064_s16 = scalar_lea.hbm %s1693_s2, 8192 }
 0x1b1   : > { %p1061_p3 = scmp.ne.s32.totalorder %s1642_s28, %s1060_s3  ;;  %p1065_p1 = scmp.lt.s32.totalorder %s1642_s28, %s1693_s2 }
 0x1b2   : > { %p1066_p6 = scmp.lt.s32.totalorder %s1064_s16, %s1060_s3 }
 0x1b3   : > { %p1062_p5 = pnand %p1061_p3, %p1737_p13 }
 0x1b4   : > { %p1067_p11 = por %p1066_p6, %p1065_p1 }
 0x1b5   : > { %p1063_p4 = pneg %p1062_p5 }
 0x1b7   : > { %p1068_p12 = pnand %p1067_p11, %p1063_p4 }
 0x1b9   : > { %1071 = shalt.err (!%p1068_p12)
}
 0x1ba   : > { %s1122_s23 = smov 256   ;;  %s1123_s5 = smov 16  }
 0x1bb   : > { %885 = dma.vmem_to_hbm [thread:$0]  (%p1737_p13), %s1644_s17, 4096, %s1642_s28, %s745_s13, %s1122_s23, %s1122_s23, %s1123_s5  }
 0x1bc PF: > { %s773_s7 = sand.u32 1, %s1102_s9   ;;  %p1738_p7 = scmp.ne.s32.totalorder %s1711_s22, 0 }
 0x1bd   : > { %p1739_p8 = scmp.ge.s32.totalorder %s1114_s12, 2  ;;  %s774_s8 = scalar_lea.sflag [#allocation4], %s773_s7 }
 0x1bf   : > { %p896_p9 = pnand %p1739_p8, %p1738_p7 }
 0x1c1   : > { %p897_p10 = pneg %p896_p9 }
 0x1c3   : > { %1097 = dma.done.wait (%p897_p10), %s774_s8, 4096  }
 0x1c4   : > { %1099 = vsyncadd (%p897_p10), %s774_s8, 4294963200  ;;  %p16_p2 = scmp.ge.s32.totalorder %s1164_s15, 4   ;;  %s1740_s9 = smov %s1106_s10 }
 0x1c5   : > { %s1741_s10 = smov %s1110_s11  ;;  %s1742_s11 = smov %s1176_s18 }
 0x1c6   : > { %s1743_s12 = smov %s1164_s15  ;;  %18 = sbr.rel (!%p16_p2) target bundleno = 6 (0x6), region = 78 }
 0x1cb   :  { %779 = vsyncpa [#allocation3], 1 }
 0x1cc   :  { %781 = vsyncpa [#allocation3 + $0x1], 1 }
 0x1cd   :  { %782 = vsyncpa [#allocation4], 1 }
 0x1ce   :  { %784 = vsyncpa [#allocation4 + $0x1], 1 }
 0x1cf   :  { %785 = vsyncpa [#allocation5], 1 }
 0x1d0   :  { %787 = vsyncpa [#allocation5 + $0x1], 1 }

</bundles_post_ra>
